<compile_context>
chip_gen: v5e
topology: v5e:2x2
jax: 0.10.0
libtpu: 0.0.40
codegen_flags: <defaults>
</compile_context>

<pallas_src>
import jax
import jax.numpy as jnp
from jax.experimental import pallas as pl
from jax.experimental.pallas import tpu as pltpu


def actor_critic_kernel(x_ref, w1_ref, b1_ref, wh_ref, bh_ref, mask_ref,
                        pol_ref, val_ref):
    F = x_ref.shape[1]
    A = pol_ref.shape[1]          # n_actions (static, from the output block shape)

    x = x_ref[...]

    # ---- fc1 + ReLU ----
    if F <= 8:
        # K is tiny (4 for CartPole): a short chain of VPU broadcast FMAs beats an MXU
        # matmul that would use <5% of the systolic array and still pay its latency.
        h = (b1_ref[...].astype(jnp.float32)
             + x[:, 0:1].astype(jnp.float32) * w1_ref[0:1, :].astype(jnp.float32))
        for f in range(1, F):  # static loop; F known at trace time
            h = h + x[:, f:f + 1].astype(jnp.float32) * w1_ref[f:f + 1, :].astype(jnp.float32)
    else:
        h = (jnp.dot(x, w1_ref[...], preferred_element_type=jnp.float32)
             + b1_ref[...].astype(jnp.float32))
    h = jnp.maximum(h, 0.0)

    # ---- fused heads: one MXU matmul -> [actor logits | critic value | zero pad] ----
    fused = (jnp.dot(h.astype(wh_ref.dtype), wh_ref[...],
                     preferred_element_type=jnp.float32)
             + bh_ref[...])

    # Softmax over the actor lanes only.  mask_ref is 0 on lanes [0, A) and -1e30 on
    # the critic + pad lanes, so masked lanes exp() to exactly 0 — no iota / where.
    logits = fused + mask_ref[...]
    m = jnp.max(logits, axis=-1, keepdims=True)
    e = jnp.exp(logits - m)
    denom = jnp.sum(e, axis=-1, keepdims=True)
    r = pl.reciprocal(denom, approx=True)       # EUP vrcp — off the VALU slot
    r = r * (2.0 - denom * r)                   # one NR step on (TM, 1): ~f32-exact
    policy = e * r

    # Narrow, direct stores: policy lanes [0, A) and the critic lane A.
    pol_ref[...] = policy[:, :A].astype(pol_ref.dtype)
    val_ref[...] = fused[:, A:A + 1].astype(val_ref.dtype)


def prepare_params(w1, b1, wa, ba, wc, bc, *, dtype=jnp.float32):
    """Build the fused / lane-padded head weights ONCE (hoisted out of the call path).

    Returns a dict reusable across all forward calls. `dtype` (e.g. bfloat16) applies
    to the matmul operands only; biases and the softmax mask stay f32.
    """
    H, A = wa.shape
    Np = ((A + 1 + 127) // 128) * 128
    wh = (jnp.zeros((H, Np), jnp.float32)
          .at[:, :A].set(wa.astype(jnp.float32))
          .at[:, A:A + 1].set(wc.astype(jnp.float32)))
    bh = (jnp.zeros((1, Np), jnp.float32)
          .at[:, :A].set(ba.astype(jnp.float32))
          .at[:, A:A + 1].set(bc.astype(jnp.float32)))
    # Additive softmax mask: 0 on actor lanes, -1e30 on the critic + pad lanes.
    amask = jnp.full((1, Np), -1e30, jnp.float32).at[:, :A].set(0.0)
    return {
        "w1": w1.astype(dtype),
        "b1": b1.astype(jnp.float32),
        "wh": wh.astype(dtype),
        "bh": bh,
        "amask": amask,
        "n_actions": A,
    }


def actor_critic_forward(x, params, *, tm=512):
    """Returns (policy (B, n_actions), value (B, 1)) matching ActorCriticNet.forward."""
    w1, b1 = params["w1"], params["b1"]
    wh, bh, amask = params["wh"], params["bh"], params["amask"]
    A = params["n_actions"]

    B, F = x.shape
    H = w1.shape[1]
    Np = wh.shape[1]

    # Cast x to the matmul dtype chosen at prepare time (no-op for f32).
    xc = x if x.dtype == w1.dtype else x.astype(w1.dtype)

    # Batch tiling: TM rows per grid step, weights VMEM-resident across steps.
    # tm=512 hits the HBM roofline, keeps temporaries small, and gives v7x's 2 TCs
    # multiple grid steps.  Non-multiple B -> partial last block (no host-side pad).
    TM = B if B <= tm else tm
    grid = (pl.cdiv(B, TM),)

    policy, value = pl.pallas_call(
        actor_critic_kernel,
        out_shape=(
            jax.ShapeDtypeStruct((B, A), jnp.float32),
            jax.ShapeDtypeStruct((B, 1), jnp.float32),
        ),
        grid=grid,
        in_specs=[
            pl.BlockSpec((TM, F), lambda i: (i, 0)),    # x: tiled over batch
            pl.BlockSpec((F, H), lambda i: (0, 0)),     # w1: resident
            pl.BlockSpec((1, H), lambda i: (0, 0)),     # b1: resident
            pl.BlockSpec((H, Np), lambda i: (0, 0)),    # fused head weights: resident
            pl.BlockSpec((1, Np), lambda i: (0, 0)),    # fused head bias: resident
            pl.BlockSpec((1, Np), lambda i: (0, 0)),    # softmax mask: resident
        ],
        out_specs=(
            pl.BlockSpec((TM, A), lambda i: (i, 0)),    # policy: narrow, batch-tiled
            pl.BlockSpec((TM, 1), lambda i: (i, 0)),    # value: narrow, batch-tiled
        ),
        compiler_params=pltpu.CompilerParams(
            dimension_semantics=("parallel",)),         # v7x: shard batch over 2 TCs
    )(xc, w1, b1, wh, bh, amask)
    return policy, value


def init_params(key, n_features, n_actions, n_hidden=32):
    # Deterministic synthetic init (PyTorch-like uniform fan-in bounds).
    k1, k2, k3, k4, k5, k6 = jax.random.split(key, 6)

    def uniform(k, shape, fan_in):
        bound = 1.0 / jnp.sqrt(fan_in)
        return jax.random.uniform(k, shape, jnp.float32, -bound, bound)

    w1 = uniform(k1, (n_features, n_hidden), n_features)
    b1 = uniform(k2, (1, n_hidden), n_features)
    wa = uniform(k3, (n_hidden, n_actions), n_hidden)
    ba = uniform(k4, (1, n_actions), n_hidden)
    wc = uniform(k5, (n_hidden, 1), n_hidden)
    bc = uniform(k6, (1, 1), n_hidden)
    return w1, b1, wa, ba, wc, bc


def reference_forward(x, w1, b1, wa, ba, wc, bc):
    h = jnp.maximum(x @ w1 + b1, 0.0)
    logits = h @ wa + ba
    policy = jax.nn.softmax(logits, axis=-1)
    value = h @ wc + bc
    return policy, value


if __name__ == "__main__":
    # CartPole-like sizes: n_features=4, n_actions=2, n_hidden=32, batch=2
    B, n_features, n_actions, n_hidden = 2, 4, 2, 32

    key = jax.random.PRNGKey(0)
    kx, kp = jax.random.split(key)
    x = jax.random.normal(kx, (B, n_features), jnp.float32)
    raw = init_params(kp, n_features, n_actions, n_hidden)

    # Head fusion built ONCE, outside the per-call path.
    params_f32 = prepare_params(*raw)

    # Small-batch (single RL step style) f32 path — strict check.
    policy, value = actor_critic_forward(x, params_f32)
    jax.block_until_ready((policy, value))
    ref_policy, ref_value = reference_forward(x, *raw)
    assert policy.shape == (B, n_actions) and value.shape == (B, 1)
    assert jnp.allclose(policy, ref_policy, atol=1e-5, rtol=1e-5)
    assert jnp.allclose(value, ref_value, atol=1e-5, rtol=1e-5)

    # Larger, non-multiple batch exercising the tiled "parallel" grid with a partial
    # last block (no host-side padding), f32.
    Bl = 2048 + 3
    xl = jax.random.normal(jax.random.PRNGKey(1), (Bl, n_features), jnp.float32)
    pol_l, val_l = actor_critic_forward(xl, params_f32)
    jax.block_until_ready((pol_l, val_l))
    ref_pol_l, ref_val_l = reference_forward(xl, *raw)
    assert pol_l.shape == (Bl, n_actions) and val_l.shape == (Bl, 1)
    assert jnp.allclose(pol_l, ref_pol_l, atol=1e-4, rtol=1e-4)
    assert jnp.allclose(val_l, ref_val_l, atol=1e-4, rtol=1e-4)

    # bf16 throughput mode (halves the HBM read of x at large batch) — loose check.
    params_bf16 = prepare_params(*raw, dtype=jnp.bfloat16)
    pol_b, val_b = actor_critic_forward(xl, params_bf16)
    jax.block_until_ready((pol_b, val_b))
    assert jnp.allclose(pol_b, ref_pol_l, atol=5e-2, rtol=5e-2)
    assert jnp.allclose(val_b, ref_val_l, atol=5e-2, rtol=5e-2)

    print("KERNEL_OK")
</pallas_src>

<mosaic_0001>
module attributes {stable_mosaic.version = 11 : i64} {
  func.func @actor_critic_kernel(%arg0: i32, %arg1: memref<2x4xf32, #tpu.memory_space<vmem>>, %arg2: memref<4x32xf32, #tpu.memory_space<vmem>>, %arg3: memref<1x32xf32, #tpu.memory_space<vmem>>, %arg4: memref<32x128xf32, #tpu.memory_space<vmem>>, %arg5: memref<1x128xf32, #tpu.memory_space<vmem>>, %arg6: memref<1x128xf32, #tpu.memory_space<vmem>>, %arg7: memref<2x2xf32, #tpu.memory_space<vmem>>, %arg8: memref<2x1xf32, #tpu.memory_space<vmem>>) attributes {dimension_semantics = [#tpu.dimension_semantics<parallel>], iteration_bounds = array<i64: 1>, scalar_prefetch = 0 : i64, scratch_operands = 0 : i64, tpu.core_type = #tpu.core_type<tc>, window_params = [{transform_indices = @transform_0, window_bounds = array<i64: 2, 4>}, {pipeline_mode = #tpu.pipeline_mode<synchronous>, transform_indices = @transform_1, window_bounds = array<i64: 4, 32>}, {pipeline_mode = #tpu.pipeline_mode<synchronous>, transform_indices = @transform_2, window_bounds = array<i64: 1, 32>}, {pipeline_mode = #tpu.pipeline_mode<synchronous>, transform_indices = @transform_3, window_bounds = array<i64: 32, 128>}, {pipeline_mode = #tpu.pipeline_mode<synchronous>, transform_indices = @transform_4, window_bounds = array<i64: 1, 128>}, {pipeline_mode = #tpu.pipeline_mode<synchronous>, transform_indices = @transform_5, window_bounds = array<i64: 1, 128>}, {transform_indices = @transform_6, window_bounds = array<i64: 2, 2>}, {transform_indices = @transform_7, window_bounds = array<i64: 2, 1>}]} {
    %c0 = arith.constant 0 : index
    %c0_0 = arith.constant 0 : index
    %0 = vector.load %arg1[%c0, %c0_0] : memref<2x4xf32, #tpu.memory_space<vmem>>, vector<2x4xf32>
    %c0_1 = arith.constant 0 : index
    %c0_2 = arith.constant 0 : index
    %1 = vector.load %arg3[%c0_1, %c0_2] : memref<1x32xf32, #tpu.memory_space<vmem>>, vector<1x32xf32>
    %2 = vector.extract_strided_slice %0 {offsets = [0, 0], sizes = [2, 1], strides = [1, 1]} : vector<2x4xf32> to vector<2x1xf32>
    %c0_3 = arith.constant 0 : index
    %c0_4 = arith.constant 0 : index
    %3 = vector.load %arg2[%c0_3, %c0_4] : memref<4x32xf32, #tpu.memory_space<vmem>>, vector<1x32xf32>
    %4 = vector.broadcast %2 : vector<2x1xf32> to vector<2x32xf32>
    %5 = vector.broadcast %3 : vector<1x32xf32> to vector<2x32xf32>
    %6 = arith.mulf %4, %5 : vector<2x32xf32>
    %7 = vector.broadcast %1 : vector<1x32xf32> to vector<2x32xf32>
    %8 = arith.addf %7, %6 : vector<2x32xf32>
    %9 = vector.extract_strided_slice %0 {offsets = [0, 1], sizes = [2, 1], strides = [1, 1]} : vector<2x4xf32> to vector<2x1xf32>
    %c1 = arith.constant 1 : index
    %c0_5 = arith.constant 0 : index
    %10 = vector.load %arg2[%c1, %c0_5] : memref<4x32xf32, #tpu.memory_space<vmem>>, vector<1x32xf32>
    %11 = vector.broadcast %9 : vector<2x1xf32> to vector<2x32xf32>
    %12 = vector.broadcast %10 : vector<1x32xf32> to vector<2x32xf32>
    %13 = arith.mulf %11, %12 : vector<2x32xf32>
    %14 = arith.addf %8, %13 : vector<2x32xf32>
    %15 = vector.extract_strided_slice %0 {offsets = [0, 2], sizes = [2, 1], strides = [1, 1]} : vector<2x4xf32> to vector<2x1xf32>
    %c2 = arith.constant 2 : index
    %c0_6 = arith.constant 0 : index
    %16 = vector.load %arg2[%c2, %c0_6] : memref<4x32xf32, #tpu.memory_space<vmem>>, vector<1x32xf32>
    %17 = vector.broadcast %15 : vector<2x1xf32> to vector<2x32xf32>
    %18 = vector.broadcast %16 : vector<1x32xf32> to vector<2x32xf32>
    %19 = arith.mulf %17, %18 : vector<2x32xf32>
    %20 = arith.addf %14, %19 : vector<2x32xf32>
    %21 = vector.extract_strided_slice %0 {offsets = [0, 3], sizes = [2, 1], strides = [1, 1]} : vector<2x4xf32> to vector<2x1xf32>
    %c3 = arith.constant 3 : index
    %c0_7 = arith.constant 0 : index
    %22 = vector.load %arg2[%c3, %c0_7] : memref<4x32xf32, #tpu.memory_space<vmem>>, vector<1x32xf32>
    %23 = vector.broadcast %21 : vector<2x1xf32> to vector<2x32xf32>
    %24 = vector.broadcast %22 : vector<1x32xf32> to vector<2x32xf32>
    %25 = arith.mulf %23, %24 : vector<2x32xf32>
    %26 = arith.addf %20, %25 : vector<2x32xf32>
    %cst = arith.constant 0.000000e+00 : f32
    %27 = vector.broadcast %cst : f32 to vector<2x32xf32>
    %28 = arith.maximumf %26, %27 : vector<2x32xf32>
    %c0_8 = arith.constant 0 : index
    %c0_9 = arith.constant 0 : index
    %29 = vector.load %arg4[%c0_8, %c0_9] : memref<32x128xf32, #tpu.memory_space<vmem>>, vector<32x128xf32>
    %cst_10 = arith.constant dense<0.000000e+00> : vector<2x128xf32>
    %30 = tpu.matmul %28, %29, %cst_10 {dimension_numbers = #tpu.dot_dimension_numbers<[1], [0], [0], [1], [0, 0, 1, 1], [], []>} : vector<2x32xf32>, vector<32x128xf32>, vector<2x128xf32> -> vector<2x128xf32>
    %c0_11 = arith.constant 0 : index
    %c0_12 = arith.constant 0 : index
    %31 = vector.load %arg5[%c0_11, %c0_12] : memref<1x128xf32, #tpu.memory_space<vmem>>, vector<1x128xf32>
    %32 = vector.broadcast %31 : vector<1x128xf32> to vector<2x128xf32>
    %33 = arith.addf %30, %32 : vector<2x128xf32>
    %c0_13 = arith.constant 0 : index
    %c0_14 = arith.constant 0 : index
    %34 = vector.load %arg6[%c0_13, %c0_14] : memref<1x128xf32, #tpu.memory_space<vmem>>, vector<1x128xf32>
    %35 = vector.broadcast %34 : vector<1x128xf32> to vector<2x128xf32>
    %36 = arith.addf %33, %35 : vector<2x128xf32>
    %cst_15 = arith.constant dense<0xFF800000> : vector<2xf32>
    %37 = vector.multi_reduction <maximumf>, %36, %cst_15 [1] : vector<2x128xf32> to vector<2xf32>
    %38 = vector.shape_cast %37 : vector<2xf32> to vector<2x1xf32>
    %39 = vector.broadcast %38 : vector<2x1xf32> to vector<2x128xf32>
    %40 = arith.subf %36, %39 : vector<2x128xf32>
    %41 = math.exp %40 : vector<2x128xf32>
    %cst_16 = arith.constant dense<0.000000e+00> : vector<2xf32>
    %42 = vector.multi_reduction <add>, %41, %cst_16 [1] : vector<2x128xf32> to vector<2xf32>
    %43 = vector.shape_cast %42 : vector<2xf32> to vector<2x1xf32>
    %44 = tpu.reciprocal %43 {approx = true} : vector<2x1xf32> -> vector<2x1xf32>
    %45 = arith.mulf %43, %44 : vector<2x1xf32>
    %cst_17 = arith.constant 2.000000e+00 : f32
    %46 = vector.broadcast %cst_17 : f32 to vector<2x1xf32>
    %47 = arith.subf %46, %45 : vector<2x1xf32>
    %48 = arith.mulf %44, %47 : vector<2x1xf32>
    %49 = vector.broadcast %48 : vector<2x1xf32> to vector<2x128xf32>
    %50 = arith.mulf %41, %49 : vector<2x128xf32>
    %51 = vector.extract_strided_slice %50 {offsets = [0, 0], sizes = [2, 2], strides = [1, 1]} : vector<2x128xf32> to vector<2x2xf32>
    %c0_18 = arith.constant 0 : index
    %c0_19 = arith.constant 0 : index
    %52 = vector.load %arg7[%c0_18, %c0_19] : memref<2x2xf32, #tpu.memory_space<vmem>>, vector<2x2xf32>
    tpu.vector_store %arg7[%c0_18, %c0_19], %51 {strides = array<i32>} : memref<2x2xf32, #tpu.memory_space<vmem>>, vector<2x2xf32>,
    %53 = vector.extract_strided_slice %33 {offsets = [0, 2], sizes = [2, 1], strides = [1, 1]} : vector<2x128xf32> to vector<2x1xf32>
    %c0_20 = arith.constant 0 : index
    %c0_21 = arith.constant 0 : index
    %54 = vector.load %arg8[%c0_20, %c0_21] : memref<2x1xf32, #tpu.memory_space<vmem>>, vector<2x1xf32>
    tpu.vector_store %arg8[%c0_20, %c0_21], %53 {strides = array<i32>} : memref<2x1xf32, #tpu.memory_space<vmem>>, vector<2x1xf32>,
    return
  }
  func.func @transform_0(%arg0: i32) -> (i32, i32) {
    %c0_i32 = arith.constant 0 : i32
    %c0_i32_0 = arith.constant 0 : i32
    return %arg0, %c0_i32 : i32, i32
  }
  func.func @transform_1(%arg0: i32) -> (i32, i32) {
    %c0_i32 = arith.constant 0 : i32
    %c0_i32_0 = arith.constant 0 : i32
    %c0_i32_1 = arith.constant 0 : i32
    return %c0_i32, %c0_i32_0 : i32, i32
  }
  func.func @transform_2(%arg0: i32) -> (i32, i32) {
    %c0_i32 = arith.constant 0 : i32
    %c0_i32_0 = arith.constant 0 : i32
    %c0_i32_1 = arith.constant 0 : i32
    return %c0_i32, %c0_i32_0 : i32, i32
  }
  func.func @transform_3(%arg0: i32) -> (i32, i32) {
    %c0_i32 = arith.constant 0 : i32
    %c0_i32_0 = arith.constant 0 : i32
    %c0_i32_1 = arith.constant 0 : i32
    return %c0_i32, %c0_i32_0 : i32, i32
  }
  func.func @transform_4(%arg0: i32) -> (i32, i32) {
    %c0_i32 = arith.constant 0 : i32
    %c0_i32_0 = arith.constant 0 : i32
    %c0_i32_1 = arith.constant 0 : i32
    return %c0_i32, %c0_i32_0 : i32, i32
  }
  func.func @transform_5(%arg0: i32) -> (i32, i32) {
    %c0_i32 = arith.constant 0 : i32
    %c0_i32_0 = arith.constant 0 : i32
    %c0_i32_1 = arith.constant 0 : i32
    return %c0_i32, %c0_i32_0 : i32, i32
  }
  func.func @transform_6(%arg0: i32) -> (i32, i32) {
    %c0_i32 = arith.constant 0 : i32
    %c0_i32_0 = arith.constant 0 : i32
    return %arg0, %c0_i32 : i32, i32
  }
  func.func @transform_7(%arg0: i32) -> (i32, i32) {
    %c0_i32 = arith.constant 0 : i32
    %c0_i32_0 = arith.constant 0 : i32
    return %arg0, %c0_i32 : i32, i32
  }
}

</mosaic_0001>

<bundles_post_ra>
// kernel: tpu_custom_call.1
= control target key start
LH: loop header
LB: loop body
LE: loop exit
PB: predicated region body
PF: predicated region fallthrough
CT: control target
= control target key end

     0   :  { %13 = vsyncpa [#allocation3], 0  ;;  %s395_s0 = inlined_call_operand.hbm [shape: f32[2,4], index: 0, kind: input, shape index: {}]   ;;  %s396_s1 = inlined_call_operand.hbm [shape: f32[4,32], index: 1, kind: input, shape index: {}]   ;;  %s397_s2 = inlined_call_operand.vmem [shape: f32[1,32], index: 2, kind: input, shape index: {}]   ;;  %s398_s3 = inlined_call_operand.hbm [shape: f32[32,128], index: 3, kind: input, shape index: {}]   ;;  %s399_s4 = inlined_call_operand.vmem [shape: f32[1,128], index: 4, kind: input, shape index: {}]   ;;  %s400_s5 = inlined_call_operand.vmem [shape: f32[1,128], index: 5, kind: input, shape index: {}]   ;;  %s401_s6 = inlined_call_operand.hbm [shape: f32[2,2], index: 6, kind: output, shape index: {0}]   ;;  %s402_s7 = inlined_call_operand.vmem [shape: f32[2,1], index: 7, kind: output, shape index: {1}]  }
   0x1   :  { %14 = vsyncpa [#allocation6], 0  ;;  %s32_s26 = sshll.u32 %s396_s1, 4  ;;  %s33_s26 = int_to_ptr.hbm [resolvable:$true] %s32_s26 }
   0x2   :  { %15 = vsyncpa [#allocation4], 0  ;;  %s320_s27 = smov [#allocation5]   ;;  %s21_s8 = sshll.u32 %s395_s0, 4  ;;  %s22_s8 = int_to_ptr.hbm [resolvable:$true] %s21_s8 }
   0x3   :  { %s34_s28 = sshll.u32 %s320_s27, 4  ;;  %s321_s9 = smov [#allocation2]   ;;  %s35_s28 = int_to_ptr.vmem [resolvable:$true] %s34_s28 }
   0x4   :  { %37 = dma.hbm_to_vmem [thread:$0]  %s33_s26, 64, %s35_s28, [#allocation6]  }
   0x5   :  { %s23_s10 = sshll.u32 %s321_s9, 4  ;;  %s44_s13 = sshll.u32 %s398_s3, 4  ;;  %s24_s10 = int_to_ptr.vmem [resolvable:$true] %s23_s10  ;;  %s45_s13 = int_to_ptr.hbm [resolvable:$true] %s44_s13 }
   0x6   :  { %26 = dma.hbm_to_vmem [thread:$0]  %s22_s8, 32, %s24_s10, [#allocation3]  }
   0x7   :  { %s322_s1 = smov [#allocation7]   ;;  %s323_s15 = smov 128  }
   0x8   :  { %s46_s14 = sshll.u32 %s322_s1, 4  ;;  %s324_s16 = smov 8   ;;  %s47_s14 = int_to_ptr.vmem [resolvable:$true] %s46_s14 }
   0x9   :  { %52 = dma.hbm_to_vmem [thread:$0]  %s45_s13, 512, %s47_s14, [#allocation6], %s323_s15, %s323_s15, %s324_s16  }
   0xa   :  { %314 = dma.done.wait [#allocation3], 32  }
   0xb   :  { %315 = vsyncadd [#allocation3], 4294967264 }
   0xc   :  { %316 = dma.done.wait [#allocation6], 576  }
   0xd   :  { %317 = vsyncadd [#allocation6], 4294966720  ;;  %v325_v0 = vmov 0   ;;  %v326_v1 = vmov 2   ;;  %v69_v2 = vld [vmem:[#allocation2] sm:$0x3] }
   0xe   :  { %202 = vset.pattern.permute.xlu0 %v325_v0  ;;  %204 = vset.pattern.permute.xlu1 %v326_v1  ;;  %v327_v3 = vmov 1   ;;  %v328_v4 = vmov 3   ;;  %v111_v5 = vld [vmem:[#allocation7 + $0x18] sm:$0xff]  ;;  %v110_v6 = vld [vmem:[#allocation7 + $0x10] sm:$0xff]  ;;  %v109_v7 = vld [vmem:[#allocation7 + $0x8] sm:$0xff]  ;;  %vm116_vm0 = vcmask 261120  }
   0xf   :  { %74 = vperm.xlu0 %202, %v69_v2   ;;  %93 = vperm.xlu1 %204, %v69_v2   ;;  %v108_v8 = vld [vmem:[#allocation7] sm:$0xff]  ;;  %v207_v11 = vld [vmem:[#allocation5] ss:$0 sm:$0xff]  ;;  %v208_v12 = vld [vmem:[%s397_s2] ss:$0 sm:$0xff]  ;;  %vm145_vm1 = vcmask 1041408  }
  0x10   :  { %132 = vmatpush.msra.mxu0 %v111_v5  ;;  %v210_v14 = vld [vmem:[#allocation5 + $0x1] ss:$0 sm:$0xff]  ;;  %v209_v15 = vld [vmem:[#allocation5 + $0x2] ss:$0 sm:$0xff]  ;;  %v211_v16 = vld [vmem:[#allocation5 + $0x3] ss:$0 sm:$0xff] }
  0x11   :  { %v212_v27 = vld [vmem:[%s399_s4] ss:$0 sm:$0xff]  ;;  %s329_s20 = smov 126   ;;  %vm166_vm2 = vcmask 1024   ;;  %s330_s4 = smov [#allocation8]   ;;  %vm160_vm3 = vcmask 9216  }
  0x12   :  { %133 = vmatpush.msra.mxu0 %v110_v6  ;;  %v213_v28 = vld [vmem:[%s400_s5] ss:$0 sm:$0xff]  ;;  %s173_s5 = sshll.u32 %s330_s4, 4  ;;  %s175_s25 = sshll.u32 %s401_s6, 4  ;;  %s174_s5 = int_to_ptr.vmem [resolvable:$true] %s173_s5  ;;  %s176_s25 = int_to_ptr.hbm [resolvable:$true] %s175_s25 }
  0x14   :  { %134 = vmatpush.msra.mxu0 %v109_v7 }
  0x16   :  { %135 = vmatpush.msra.mxu0 %v108_v8 }
  0x17   :  { %203 = vset.pattern.permute.xlu0 %v327_v3  ;;  %205 = vset.pattern.permute.xlu1 %v328_v4 }
  0x18   :  { %85 = vperm.xlu0 %203, %v69_v2   ;;  %101 = vperm.xlu1 %205, %v69_v2  }
  0x20   :  { %206 = vset.pattern.permute.xlu0 %v328_v4 }
  0x81   :  { %v75_v9 = vpop.permute.xlu0 %74  ;;  %v94_v10 = vpop.permute.xlu1 %93 }
  0x82   :  { %v78_v13 = vmul.f32 %v207_v11, %v75_v9  ;;  %v97_v21 = vmul.f32 %v209_v15, %v94_v10 }
  0x84   :  { %v82_v19 = vadd.f32 %v208_v12, %v78_v13 }
  0x8a   :  { %v86_v17 = vpop.permute.xlu0 %85  ;;  %v102_v18 = vpop.permute.xlu1 %101 }
  0x8b   :  { %v89_v20 = vmul.f32 %v210_v14, %v86_v17  ;;  %v105_v23 = vmul.f32 %v211_v16, %v102_v18 }
  0x8d   :  { %v90_v22 = vadd.f32 %v89_v20, %v82_v19 }
  0x8f   :  { %v98_v24 = vadd.f32 %v97_v21, %v90_v22 }
  0x91   :  { %v106_v25 = vadd.f32 %v105_v23, %v98_v24 }
  0x93   :  { %v107_v26 = vmax.f32 %v106_v25, 0.0 }
  0x95   :  { %190 = vmatmul.msk.f32.vlgmr.msra.gmra.mxu0 %vm116_vm0, %v107_v26 }
 0x112   :  { %v137_v29 = vpop.f32.mrf.mxu0 }
 0x113   :  { %v138_v30 = vadd.f32 %v212_v27, %v137_v29 }
 0x115   :  { %163 = vrot.lane.b32.xlu1 %v138_v30, %s329_s20  ;;  %v144_v31 = vadd.f32 %v213_v28, %v138_v30 }
 0x117   :  { %v146_v32 = vsel %vm145_vm1, %v144_v31, -inf }
 0x118   :  { %147 = vmax.xlane.f32.xlu2 %v146_v32 }
 0x187   :  { %v164_v33 = vpop.permute.xlu1 %163 }
 0x188   :  { %167 = vst.msk [vmem:[%s402_s7] sm:$0x3] %vm166_vm2, %v164_v33 }
 0x18b   :  { %v148_v34 = vpop.xlane.xlu2 %147 }
 0x18c   :  { %v149_v35 = vsub.f32 %v144_v31, %v148_v34 }
 0x18e   :  { %v150_v36 = vmul.f32 1.442695, %v149_v35 }
 0x190   :  { %214 = vpow2.f32 %v150_v36 }
 0x196   :  { %v215_v37 = vpop.eup %214 }
 0x197   :  { %v152_v38 = vsel %vm145_vm1, %v215_v37, 0.0 }
 0x198   :  { %153 = vadd.xlane.f32.xlu2 %v152_v38 }
 0x20b   :  { %v154_v39 = vpop.xlane.xlu2 %153 }
 0x20c   :  { %216 = vrcp.f32 %v154_v39 }
 0x212   :  { %v217_v40 = vpop.eup %216 }
 0x213   :  { %v156_v41 = vmul.f32 %v217_v40, %v154_v39 }
 0x215   :  { %v157_v42 = vsub.f32 2.0, %v156_v41 }
 0x217   :  { %v158_v43 = vmul.f32 %v217_v40, %v157_v42 }
 0x219   :  { %v159_v44 = vmul.f32 %v215_v37, %v158_v43 }
 0x21b   :  { %161 = vst.msk [vmem:[#allocation8] sm:$0x3] %vm160_vm3, %v159_v44 }
 0x21c   :  { %178 = dma.vmem_to_hbm [thread:$0]  %s174_s5, 32, %s176_s25, [#allocation4]  }
 0x21d   :  { %318 = dma.done.wait [#allocation4], 32  }
 0x21e   :  { %319 = vsyncadd [#allocation4], 4294967264 }
 0x21f   :  { %187 = vsyncpa [#allocation3], 1 }
 0x220   :  { %188 = vsyncpa [#allocation6], 1 }
 0x221   :  { %189 = vsyncpa [#allocation4], 1 }

</bundles_post_ra>
